<compile_context>
chip_gen: v5e
topology: v5e:2x2
jax: 0.10.0
libtpu: 0.0.40
codegen_flags: <defaults>
</compile_context>

<pallas_src>
import functools

import jax
import jax.numpy as jnp
from jax import lax
from jax.experimental import pallas as pl
from jax.experimental.pallas import tpu as pltpu


# ---------------------------------------------------------------------------
# Kernels
# ---------------------------------------------------------------------------

def _gram_only_kernel(f_ref, g_ref, *, inv_denom):
    """Gram matrix only (used for the one-time target precompute).

    Grid axis 0 walks K in tiles (reduction axis -> 'arbitrary').  The f32
    (M, M) output block has a constant index map, so it is resident in VMEM
    across the whole grid and we accumulate into it directly.
    """
    k = pl.program_id(0)

    @pl.when(k == 0)
    def _():
        g_ref[...] = jnp.zeros_like(g_ref)

    f = f_ref[...]  # (M, tk)
    # Contract over axis 1 of both operands: F @ F^T without an explicit
    # transpose copy in VMEM.  f32 MXU accumulation.
    g_ref[...] += lax.dot_general(
        f, f,
        dimension_numbers=(((1,), (1,)), ((), ())),
        preferred_element_type=jnp.float32,
    )

    @pl.when(k == pl.num_programs(0) - 1)
    def _():
        g_ref[...] = g_ref[...] * inv_denom


def _style_loss_kernel(f_ref, tgt_ref, g_ref, loss_ref, *, inv_denom, inv_mm):
    """Gram matrix + fused MSE loss against a precomputed target Gram."""
    k = pl.program_id(0)

    @pl.when(k == 0)
    def _():
        g_ref[...] = jnp.zeros_like(g_ref)

    f = f_ref[...]  # (M, tk)
    g_ref[...] += lax.dot_general(
        f, f,
        dimension_numbers=(((1,), (1,)), ((), ())),
        preferred_element_type=jnp.float32,
    )

    @pl.when(k == pl.num_programs(0) - 1)
    def _():
        g = g_ref[...] * inv_denom            # G = (F F^T) / (a*b*c*d)
        g_ref[...] = g
        diff = g - tgt_ref[...]
        # MSE over the (M, M) Gram matrix.
        loss_ref[...] = jnp.sum(diff * diff, keepdims=True) * inv_mm


# ---------------------------------------------------------------------------
# Wrappers
# ---------------------------------------------------------------------------

def _pick_tk(K, tk):
    """128-aligned K-tile, no larger than the (128-padded) feature width."""
    tk = max(128, (int(tk) // 128) * 128)
    return min(tk, pl.cdiv(K, 128) * 128)


def _pad_features(feats, tk):
    """Zero-pad K up to a multiple of tk (exact for a Gram sum)."""
    M, K = feats.shape
    k_pad = pl.cdiv(K, tk) * tk
    if k_pad != K:
        feats = jnp.pad(feats, ((0, 0), (0, k_pad - K)))
    return feats


def _vmem_limit_bytes(M, tk, with_target):
    feats = 2 * M * tk * 4                      # double-buffered feature tiles
    gram = M * M * 4                            # resident Gram output block
    tgt = (2 * M * M * 4) if with_target else 0
    needed = feats + gram + tgt + (1 << 20)     # + headroom for small buffers
    return int(min(max(2 * needed, 32 * 1024 * 1024), 64 * 1024 * 1024))


def _gram_only_call(features, *, denom, tk):
    """features: (M, K) f32 -> Gram (M, M) f32."""
    M, K = features.shape
    tk = _pick_tk(K, tk)
    features = _pad_features(features, tk)
    k_pad = features.shape[1]

    kernel = functools.partial(_gram_only_kernel, inv_denom=1.0 / float(denom))
    return pl.pallas_call(
        kernel,
        out_shape=jax.ShapeDtypeStruct((M, M), jnp.float32),
        grid_spec=pltpu.PrefetchScalarGridSpec(
            num_scalar_prefetch=0,
            grid=(k_pad // tk,),
            in_specs=[
                pl.BlockSpec((M, tk), lambda k: (0, k)),   # feature K-tile
            ],
            out_specs=pl.BlockSpec((M, M), lambda k: (0, 0)),  # resident Gram
        ),
        compiler_params=pltpu.CompilerParams(
            dimension_semantics=("arbitrary",),
            vmem_limit_bytes=_vmem_limit_bytes(M, tk, with_target=False),
        ),
    )(features)


def _gram_and_loss_call(features, target_gram, *, denom, tk):
    """features: (M, K) f32; target_gram: (M, M) f32 -> (G, scalar loss)."""
    M, K = features.shape
    tk = _pick_tk(K, tk)
    features = _pad_features(features, tk)
    k_pad = features.shape[1]

    kernel = functools.partial(
        _style_loss_kernel,
        inv_denom=1.0 / float(denom),
        inv_mm=1.0 / float(M * M),
    )
    g, loss = pl.pallas_call(
        kernel,
        out_shape=(
            jax.ShapeDtypeStruct((M, M), jnp.float32),
            jax.ShapeDtypeStruct((1, 1), jnp.float32),
        ),
        grid_spec=pltpu.PrefetchScalarGridSpec(
            num_scalar_prefetch=0,
            grid=(k_pad // tk,),
            in_specs=[
                pl.BlockSpec((M, tk), lambda k: (0, k)),   # feature K-tile
                pl.BlockSpec((M, M), lambda k: (0, 0)),    # target Gram (resident)
            ],
            out_specs=[
                pl.BlockSpec((M, M), lambda k: (0, 0)),    # Gram output / accumulator
                pl.BlockSpec((1, 1), lambda k: (0, 0)),    # scalar MSE loss
            ],
        ),
        compiler_params=pltpu.CompilerParams(
            dimension_semantics=("arbitrary",),
            vmem_limit_bytes=_vmem_limit_bytes(M, tk, with_target=True),
        ),
    )(features, target_gram)
    return g, loss[0, 0]


def gram_matrix(x_nchw, *, tk=512):
    """Pallas-backed gram_matrix matching the PyTorch reference."""
    a, b, c, d = x_nchw.shape
    feats = jnp.reshape(x_nchw.astype(jnp.float32), (a * b, c * d))
    return _gram_only_call(feats, denom=a * b * c * d, tk=tk)


class StyleLoss:
    """JAX/Pallas port of the PyTorch StyleLoss module."""

    def __init__(self, target_feature, *, tk=512):
        # Target Gram is "detached" (a constant) — computed once here with the
        # Gram-only kernel (no dead target DMA / loss reduction).
        self.tk = tk
        self.target = gram_matrix(target_feature, tk=tk)
        self.loss = None
        self.G = None

    def forward(self, x_nchw):
        a, b, c, d = x_nchw.shape
        feats = jnp.reshape(x_nchw.astype(jnp.float32), (a * b, c * d))
        g, loss = _gram_and_loss_call(
            feats, self.target, denom=a * b * c * d, tk=self.tk)
        self.loss = loss
        self.G = g
        return x_nchw  # forward returns its input unchanged


if __name__ == "__main__":
    key = jax.random.PRNGKey(0)
    k1, k2 = jax.random.split(key)

    # NCHW, small shapes: batch=2, channels=4, spatial=16x16
    target_feature = jax.random.normal(k1, (2, 4, 16, 16), dtype=jnp.float32)
    x = jax.random.normal(k2, (2, 4, 16, 16), dtype=jnp.float32)

    module = StyleLoss(target_feature)
    out = module.forward(x)

    out = jax.block_until_ready(out)
    loss = jax.block_until_ready(module.loss)
    g = jax.block_until_ready(module.G)

    # Lightweight correctness check against pure-JAX reference.
    a, b, c, d = x.shape
    f = x.reshape(a * b, c * d)
    g_ref = (f @ f.T) / (a * b * c * d)
    ft = target_feature.reshape(a * b, c * d)
    t_ref = (ft @ ft.T) / (a * b * c * d)
    loss_ref = jnp.mean((g_ref - t_ref) ** 2)
    assert jnp.allclose(g, g_ref, atol=1e-5, rtol=1e-5), "Gram mismatch"
    assert jnp.allclose(loss, loss_ref, atol=1e-6, rtol=1e-5), "loss mismatch"
    assert jnp.array_equal(out, x), "forward must return its input unchanged"

    print("KERNEL_OK")
</pallas_src>

<mosaic_0001>
module attributes {stable_mosaic.version = 11 : i64} {
  func.func @_gram_only_kernel(%arg0: i32, %arg1: memref<8x256xf32, #tpu.memory_space<vmem>>, %arg2: memref<8x8xf32, #tpu.memory_space<vmem>>) attributes {dimension_semantics = [#tpu.dimension_semantics<arbitrary>], iteration_bounds = array<i64: 1>, scalar_prefetch = 0 : i64, scratch_operands = 0 : i64, tpu.core_type = #tpu.core_type<tc>, window_params = [{transform_indices = @transform_0, window_bounds = array<i64: 8, 256>}, {pipeline_mode = #tpu.pipeline_mode<synchronous>, transform_indices = @transform_1, window_bounds = array<i64: 8, 8>}]} {
    %c0_i32 = arith.constant 0 : i32
    %0 = arith.cmpi eq, %arg0, %c0_i32 : i32
    %1 = arith.extui %0 : i1 to i32
    %c0_i32_0 = arith.constant 0 : i32
    %2 = arith.cmpi ne, %1, %c0_i32_0 : i32
    scf.if %2 {
      %cst_8 = arith.constant 0.000000e+00 : f32
      %11 = vector.broadcast %cst_8 : f32 to vector<8x8xf32>
      %c0_9 = arith.constant 0 : index
      %c0_10 = arith.constant 0 : index
      %12 = vector.load %arg2[%c0_9, %c0_10] : memref<8x8xf32, #tpu.memory_space<vmem>>, vector<8x8xf32>
      tpu.vector_store %arg2[%c0_9, %c0_10], %11 {strides = array<i32>} : memref<8x8xf32, #tpu.memory_space<vmem>>, vector<8x8xf32>,
    } else {
    }
    %c0 = arith.constant 0 : index
    %c0_1 = arith.constant 0 : index
    %3 = vector.load %arg1[%c0, %c0_1] : memref<8x256xf32, #tpu.memory_space<vmem>>, vector<8x256xf32>
    %c0_2 = arith.constant 0 : index
    %c0_3 = arith.constant 0 : index
    %4 = vector.load %arg2[%c0_2, %c0_3] : memref<8x8xf32, #tpu.memory_space<vmem>>, vector<8x8xf32>
    %cst = arith.constant dense<0.000000e+00> : vector<8x8xf32>
    %5 = tpu.matmul %3, %3, %cst {dimension_numbers = #tpu.dot_dimension_numbers<[1], [1], [0], [0], [0, 0, 1, 0], [], []>} : vector<8x256xf32>, vector<8x256xf32>, vector<8x8xf32> -> vector<8x8xf32>
    %6 = arith.addf %4, %5 : vector<8x8xf32>
    %c0_4 = arith.constant 0 : index
    %c0_5 = arith.constant 0 : index
    %7 = vector.load %arg2[%c0_4, %c0_5] : memref<8x8xf32, #tpu.memory_space<vmem>>, vector<8x8xf32>
    tpu.vector_store %arg2[%c0_4, %c0_5], %6 {strides = array<i32>} : memref<8x8xf32, #tpu.memory_space<vmem>>, vector<8x8xf32>,
    %c0_i32_6 = arith.constant 0 : i32
    %8 = arith.cmpi eq, %arg0, %c0_i32_6 : i32
    %9 = arith.extui %8 : i1 to i32
    %c0_i32_7 = arith.constant 0 : i32
    %10 = arith.cmpi ne, %9, %c0_i32_7 : i32
    scf.if %10 {
      %c0_8 = arith.constant 0 : index
      %c0_9 = arith.constant 0 : index
      %11 = vector.load %arg2[%c0_8, %c0_9] : memref<8x8xf32, #tpu.memory_space<vmem>>, vector<8x8xf32>
      %cst_10 = arith.constant 4.8828125E-4 : f32
      %12 = vector.broadcast %cst_10 : f32 to vector<8x8xf32>
      %13 = arith.mulf %11, %12 : vector<8x8xf32>
      %c0_11 = arith.constant 0 : index
      %c0_12 = arith.constant 0 : index
      %14 = vector.load %arg2[%c0_11, %c0_12] : memref<8x8xf32, #tpu.memory_space<vmem>>, vector<8x8xf32>
      tpu.vector_store %arg2[%c0_11, %c0_12], %13 {strides = array<i32>} : memref<8x8xf32, #tpu.memory_space<vmem>>, vector<8x8xf32>,
    } else {
    }
    return
  }
  func.func @transform_0(%arg0: i32) -> (i32, i32) {
    %c0_i32 = arith.constant 0 : i32
    %c0_i32_0 = arith.constant 0 : i32
    return %c0_i32, %arg0 : i32, i32
  }
  func.func @transform_1(%arg0: i32) -> (i32, i32) {
    %c0_i32 = arith.constant 0 : i32
    %c0_i32_0 = arith.constant 0 : i32
    %c0_i32_1 = arith.constant 0 : i32
    return %c0_i32, %c0_i32_0 : i32, i32
  }
}

</mosaic_0001>

<bundles_post_ra>
// kernel: tpu_custom_call.1
= control target key start
LH: loop header
LB: loop body
LE: loop exit
PB: predicated region body
PF: predicated region fallthrough
CT: control target
= control target key end

     0   :  { %6 = vsyncpa [#allocation3], 0  ;;  %s175_s0 = inlined_call_operand.hbm [shape: f32[8,256], index: 0, kind: input, shape index: {}]   ;;  %s176_s1 = inlined_call_operand.hbm [shape: f32[8,8], index: 1, kind: output, shape index: {}]  }
   0x1   :  { %7 = vsyncpa [#allocation4], 0  ;;  %s13_s8 = sshll.u32 %s175_s0, 4  ;;  %s153_s9 = smov [#allocation2]   ;;  %s14_s8 = int_to_ptr.hbm [resolvable:$true] %s13_s8 }
   0x2   :  { %s15_s10 = sshll.u32 %s153_s9, 4  ;;  %s16_s10 = int_to_ptr.vmem [resolvable:$true] %s15_s10 }
   0x3   :  { %18 = dma.hbm_to_vmem [thread:$0]  %s14_s8, 256, %s16_s10, [#allocation3]  }
   0x4   :  { %149 = dma.done.wait [#allocation3], 256  }
   0x5   :  { %150 = vsyncadd [#allocation3], 4294967040  ;;  %v29_v0 = vld [vmem:[#allocation2] sm:$0xff]  ;;  %v30_v1 = vld [vmem:[#allocation2 + $0x8] sm:$0xff]  ;;  %vm27_vm0 = vcmask 64512   ;;  %v154_v2 = vmov 0.0  }
   0x6   :  { %47 = vmatpush.xpose.msra.mxu0 %v29_v0  ;;  %67 = vmatpush.xpose.msra.mxu1 %v30_v1  ;;  %28 = vst.msk [vmem:[#allocation5] sm:$0xff] %vm27_vm0, %v154_v2  ;;  %s155_s0 = smov [#allocation5]   ;;  %s88_s14 = sshll.u32 %s176_s1, 4  ;;  %s89_s14 = int_to_ptr.hbm [resolvable:$true] %s88_s14 }
   0x7   :  { %s86_s11 = sshll.u32 %s155_s0, 4  ;;  %s87_s11 = int_to_ptr.vmem [resolvable:$true] %s86_s11 }
   0x9   :  { %48 = vmatmul.f32.vlgmr.msra.gmra.mxu0 %v29_v0  ;;  %68 = vmatmul.f32.vlgmr.msra.gmra.mxu1 %v30_v1 }
   0xd   :  { %v31_v4 = vld [vmem:[#allocation5] sm:$0xff] }
  0x86   :  { %v49_v3 = vpop.f32.mrf.mxu0  ;;  %v69_v5 = vpop.f32.mrf.mxu1 }
  0x87   :  { %v70_v6 = vadd.f32 %v69_v5, %v49_v3 }
  0x89   :  { %v72_v7 = vadd.f32 %v70_v6, %v31_v4 }
  0x8b   :  { %74 = vst.msk [vmem:[#allocation5] sm:$0xff] %vm27_vm0, %v72_v7 }
  0x92   :  { %v78_v8 = vld [vmem:[#allocation5] sm:$0xff] }
  0x93   :  { %v79_v9 = vmul.f32 0.00048828125, %v78_v8 }
  0x95   :  { %80 = vst.msk [vmem:[#allocation5] sm:$0xff] %vm27_vm0, %v79_v9 }
  0x96   :  { %91 = dma.vmem_to_hbm [thread:$0]  %s87_s11, 128, %s89_s14, [#allocation4]  }
  0x97   :  { %151 = dma.done.wait [#allocation4], 128  }
  0x98   :  { %152 = vsyncadd [#allocation4], 4294967168 }
  0x99   :  { %96 = vsyncpa [#allocation3], 1 }
  0x9a   :  { %97 = vsyncpa [#allocation4], 1 }

</bundles_post_ra>
